<compile_context>
chip_gen: v7x
topology: tpu7x:2x2x1
jax: 0.10.0
libtpu: 0.0.40
codegen_flags: <defaults>
</compile_context>

<pallas_src>
import math

import jax
import jax.numpy as jnp
from jax.experimental import pallas as pl
from jax.experimental.pallas import tpu as pltpu


# sigmoid(-80) ~ 1.8e-35 in f32: finite (safe for the approx EUP reciprocal, no inf),
# and its contribution to any per-class sum is negligible.
_PAD_LOGIT = -80.0


def _vmem_capacity_bytes(default=64 * 2**20):
    """Physical per-core VMEM at trace time; conservative (v7x) fallback."""
    try:
        cap = getattr(pltpu.get_tpu_info(), "vmem_capacity_bytes", None)
        if cap:
            return int(cap)
    except Exception:
        pass
    return default


def _make_soft_f1_kernel(m, tile, inner, need_mask, approx):
    """Kernel factory.  All arguments are static Python values (no tracers)."""

    def kernel(x_ref, y_ref, acc_ref):
        # acc_ref: (24, W) f32 -- rows 0:8 = sum(l*p), 8:16 = sum(p), 16:24 = sum(l).
        i = pl.program_id(1)  # inner (reduction) axis

        @pl.when(i == 0)
        def _():
            acc_ref[...] = jnp.zeros_like(acc_ref)

        logits = x_ref[...].astype(jnp.float32)
        labels = y_ref[...].astype(jnp.float32)
        # Sigmoid with exp + (approximate) reciprocal on the EUP; VALU slots stay free
        # for the multiply/accumulate work.
        probs = pl.reciprocal(1.0 + jnp.exp(-logits), approx=approx)

        if need_mask:
            # Zero rows beyond the m valid packed rows (ragged last block and any
            # clamped overhang step).  m / tile / inner are static Python ints.
            blk = pl.program_id(0) * inner + i
            valid = jnp.clip(m - blk * tile, 0, tile)                 # scalar
            row = jax.lax.broadcasted_iota(jnp.int32, (tile, 1), 0)
            keep = row < valid
            probs = jnp.where(keep, probs, 0.0)
            labels = jnp.where(keep, labels, 0.0)

        lp = labels * probs
        bt, w = lp.shape
        if bt % 8 == 0:
            # Deferred sublane reduction: pure VPU slab adds into (8, W) rows; the
            # cross-sublane (XLU) reduce happens once in the JAX epilogue.
            s = bt // 8
            acc_ref[pl.ds(0, 8), :] += jnp.sum(lp.reshape(s, 8, w), axis=0)
            acc_ref[pl.ds(8, 8), :] += jnp.sum(probs.reshape(s, 8, w), axis=0)
            acc_ref[pl.ds(16, 8), :] += jnp.sum(labels.reshape(s, 8, w), axis=0)
        else:
            # Tiny-input fallback (single full-extent block with < 8 / odd rows).
            acc_ref[pl.ds(0, 1), :] += jnp.sum(lp, axis=0, keepdims=True)
            acc_ref[pl.ds(8, 1), :] += jnp.sum(probs, axis=0, keepdims=True)
            acc_ref[pl.ds(16, 1), :] += jnp.sum(labels, axis=0, keepdims=True)

    return kernel


def soft_f1_loss(logits, labels, *, epsilon=1e-7, approx_sigmoid=True,
                 max_tile_rows=None):
    """Pallas implementation of SoftF1Loss.forward(logits, labels).

    logits / labels: (N, C).  bf16 / fp16 / f32 logits and float or integer labels are
    read at their native width; accumulation is f32.  Call under jax.jit so the lane-
    packing reshape stays metadata-only.
    """
    N, C = logits.shape
    assert labels.shape == (N, C), (logits.shape, labels.shape)

    # ---- lane packing: fold g rows into one packed row of width W (multiple of 128).
    g = 1 if C % 128 == 0 else 128 // math.gcd(C, 128)
    W = g * C
    if N % g:  # at most g-1 (< 128) filler rows, only when g does not divide N
        pad = g - N % g
        # TODO(synk): even this small pad makes XLA copy the inputs once; a fully
        # copy-free tail would need a separate unpacked kernel for the last < g rows.
        logits = jnp.pad(logits, ((0, pad), (0, 0)), constant_values=_PAD_LOGIT)
        labels = jnp.pad(labels, ((0, pad), (0, 0)), constant_values=0)
    m = logits.shape[0] // g                       # packed rows
    x = logits.reshape(m, W)                       # metadata-only (row-major)
    y = labels.reshape(m, W)

    # ---- batch tile: generation-aware VMEM budget, targeting ~4 MiB of input DMA per
    # grid step, accounting for double-buffered inputs, ~4 live f32 temps and the
    # accumulator block.
    bx, by = x.dtype.itemsize, y.dtype.itemsize
    vmem_cap = _vmem_capacity_bytes()
    budget = min(int(0.45 * vmem_cap), 32 * 2**20)
    acc_bytes = 2 * 24 * W * 4                     # double-buffered (24, W) f32 output
    per_row = 2 * W * (bx + by) + 4 * W * 4        # dbl-buffered inputs + f32 temps
    tile = max(16, (max(budget - acc_bytes, per_row * 16) // per_row) // 16 * 16)
    if max_tile_rows is not None:
        tile = max(16, min(tile, max_tile_rows) // 16 * 16)
    tile = min(tile, m)                            # full-extent block for tiny inputs

    nblk = pl.cdiv(m, tile)                        # row-blocks
    nsplit = 2 if nblk >= 2 else 1                 # 2-way parallel split (v7x dual-TC)
    inner = pl.cdiv(nblk, nsplit)                  # reduction steps per split
    need_mask = (nsplit * inner * tile) != m

    vmem_limit = int(min(0.7 * vmem_cap,
                         max(3 * (per_row * tile + acc_bytes) // 2, 16 * 2**20)))

    def in_map(p, i):  # clamp overhang steps onto the last real block (masked to zero)
        return (jnp.minimum(p * inner + i, nblk - 1), 0)

    acc = pl.pallas_call(
        _make_soft_f1_kernel(m=m, tile=tile, inner=inner, need_mask=need_mask,
                             approx=approx_sigmoid),
        out_shape=jax.ShapeDtypeStruct((nsplit * 24, W), jnp.float32),
        grid=(nsplit, inner),
        in_specs=[pl.BlockSpec((tile, W), in_map),
                  pl.BlockSpec((tile, W), in_map)],
        out_specs=pl.BlockSpec((24, W), lambda p, i: (p, 0)),
        compiler_params=pltpu.CompilerParams(
            dimension_semantics=("parallel", "arbitrary"),
            vmem_limit_bytes=vmem_limit),
    )(x, y)

    # ---- tiny O(C) epilogue: finish split / sublane / packing reductions, then the
    # soft precision / recall / F1 exactly as in the torch module.
    sums = acc.reshape(nsplit, 3, 8, g, C).sum(axis=(0, 2, 3))        # (3, C)
    tp, sum_p, sum_l = sums[0], sums[1], sums[2]
    fp = sum_p - tp                    # == sum((1-l)*p); ULP-level deviation only
    fn = sum_l - tp                    # == sum(l*(1-p))
    soft_precision = tp / (tp + fp + epsilon)
    soft_recall = tp / (tp + fn + epsilon)
    soft_f1 = 2.0 * (soft_precision * soft_recall) / (
        soft_precision + soft_recall + epsilon)
    return 1.0 - jnp.mean(soft_f1)


def soft_f1_loss_ref(logits, labels, epsilon=1e-7):
    """Pure-JAX reference mirroring the PyTorch forward exactly."""
    probs = jax.nn.sigmoid(logits)
    tp = jnp.sum(labels * probs, axis=0)
    fp = jnp.sum((1.0 - labels) * probs, axis=0)
    fn = jnp.sum(labels * (1.0 - probs), axis=0)
    soft_precision = tp / (tp + fp + epsilon)
    soft_recall = tp / (tp + fn + epsilon)
    soft_f1 = 2.0 * (soft_precision * soft_recall) / (
        soft_precision + soft_recall + epsilon)
    return 1.0 - jnp.mean(soft_f1)


if __name__ == "__main__":
    key = jax.random.PRNGKey(0)
    k1, k2, k3, k4 = jax.random.split(key, 4)

    # (1) spec-sized multi-label problem (batch=16, classes=8), exact sigmoid path.
    N, C = 16, 8
    logits = jax.random.normal(k1, (N, C), dtype=jnp.float32)
    labels = jax.random.bernoulli(k2, 0.3, (N, C)).astype(jnp.float32)
    ref = soft_f1_loss_ref(logits, labels)
    out = jax.block_until_ready(soft_f1_loss(logits, labels, approx_sigmoid=False))
    assert jnp.allclose(out, ref, atol=1e-5, rtol=1e-5), (out, ref)

    # (2) same problem through the default approximate-EUP-reciprocal sigmoid.
    out_approx = jax.block_until_ready(soft_f1_loss(logits, labels))
    assert jnp.allclose(out_approx, ref, atol=5e-2, rtol=5e-2), (out_approx, ref)

    # (3) ragged multi-block path under jit: forces several row-blocks, the 2-way
    #     "parallel" accumulator split, block clamping and in-kernel masking.
    N2, C2 = 3500, 256
    logits2 = jax.random.normal(k3, (N2, C2), dtype=jnp.float32)
    labels2 = jax.random.bernoulli(k4, 0.3, (N2, C2)).astype(jnp.float32)
    ref2 = soft_f1_loss_ref(logits2, labels2)
    f3 = jax.jit(lambda a, b: soft_f1_loss(a, b, approx_sigmoid=False,
                                           max_tile_rows=512))
    out2 = jax.block_until_ready(f3(logits2, labels2))
    assert jnp.allclose(out2, ref2, atol=1e-4, rtol=1e-4), (out2, ref2)

    # (4) bf16 inputs + lane packing where g does not divide N (small pad + fallback).
    N3, C3 = 37, 10
    logits3 = jax.random.normal(k1, (N3, C3), dtype=jnp.bfloat16)
    labels3 = jax.random.bernoulli(k2, 0.3, (N3, C3)).astype(jnp.bfloat16)
    ref3 = soft_f1_loss_ref(logits3.astype(jnp.float32), labels3.astype(jnp.float32))
    out3 = jax.block_until_ready(soft_f1_loss(logits3, labels3, approx_sigmoid=False))
    assert jnp.allclose(out3, ref3, atol=1e-4, rtol=1e-4), (out3, ref3)

    print("KERNEL_OK")
</pallas_src>

<mosaic_0001>
module attributes {stable_mosaic.version = 11 : i64} {
  func.func @kernel(%arg0: i32, %arg1: i32, %arg2: memref<1x128xf32, #tpu.memory_space<vmem>>, %arg3: memref<1x128xf32, #tpu.memory_space<vmem>>, %arg4: memref<24x128xf32, #tpu.memory_space<vmem>>) attributes {dimension_semantics = [#tpu.dimension_semantics<parallel>, #tpu.dimension_semantics<arbitrary>], iteration_bounds = array<i64: 1, 1>, scalar_prefetch = 0 : i64, scratch_operands = 0 : i64, tpu.core_type = #tpu.core_type<tc>, window_params = [{transform_indices = @transform_0, window_bounds = array<i64: 1, 128>}, {transform_indices = @transform_1, window_bounds = array<i64: 1, 128>}, {transform_indices = @transform_2, window_bounds = array<i64: 24, 128>}]} {
    %c0_i32 = arith.constant 0 : i32
    %0 = arith.cmpi eq, %arg1, %c0_i32 : i32
    %1 = arith.extui %0 : i1 to i32
    %c0_i32_0 = arith.constant 0 : i32
    %2 = arith.cmpi ne, %1, %c0_i32_0 : i32
    scf.if %2 {
      %cst_18 = arith.constant 0.000000e+00 : f32
      %27 = vector.broadcast %cst_18 : f32 to vector<24x128xf32>
      %c0_19 = arith.constant 0 : index
      %c0_20 = arith.constant 0 : index
      %28 = vector.load %arg4[%c0_19, %c0_20] : memref<24x128xf32, #tpu.memory_space<vmem>>, vector<24x128xf32>
      tpu.vector_store %arg4[%c0_19, %c0_20], %27 {strides = array<i32>} : memref<24x128xf32, #tpu.memory_space<vmem>>, vector<24x128xf32>,
    } else {
    }
    %c0 = arith.constant 0 : index
    %c0_1 = arith.constant 0 : index
    %3 = vector.load %arg2[%c0, %c0_1] : memref<1x128xf32, #tpu.memory_space<vmem>>, vector<1x128xf32>
    %c0_2 = arith.constant 0 : index
    %c0_3 = arith.constant 0 : index
    %4 = vector.load %arg3[%c0_2, %c0_3] : memref<1x128xf32, #tpu.memory_space<vmem>>, vector<1x128xf32>
    %cst = arith.constant 0.000000e+00 : f32
    %5 = vector.broadcast %cst : f32 to vector<1x128xf32>
    %6 = arith.subf %5, %3 : vector<1x128xf32>
    %7 = math.exp %6 : vector<1x128xf32>
    %cst_4 = arith.constant 1.000000e+00 : f32
    %8 = vector.broadcast %cst_4 : f32 to vector<1x128xf32>
    %9 = arith.addf %8, %7 : vector<1x128xf32>
    %10 = tpu.reciprocal %9 : vector<1x128xf32> -> vector<1x128xf32>
    %11 = arith.mulf %4, %10 : vector<1x128xf32>
    %c0_5 = arith.constant 0 : index
    %c0_6 = arith.constant 0 : index
    %12 = vector.load %arg4[%c0_5, %c0_6] : memref<24x128xf32, #tpu.memory_space<vmem>>, vector<1x128xf32>
    %cst_7 = arith.constant dense<0.000000e+00> : vector<128xf32>
    %13 = vector.multi_reduction <add>, %11, %cst_7 [0] : vector<1x128xf32> to vector<128xf32>
    %14 = vector.shape_cast %13 : vector<128xf32> to vector<1x128xf32>
    %15 = arith.addf %12, %14 : vector<1x128xf32>
    %c0_8 = arith.constant 0 : index
    %c0_9 = arith.constant 0 : index
    %16 = vector.load %arg4[%c0_8, %c0_9] : memref<24x128xf32, #tpu.memory_space<vmem>>, vector<1x128xf32>
    tpu.vector_store %arg4[%c0_8, %c0_9], %15 {strides = array<i32>} : memref<24x128xf32, #tpu.memory_space<vmem>>, vector<1x128xf32>,
    %c8 = arith.constant 8 : index
    %c0_10 = arith.constant 0 : index
    %17 = vector.load %arg4[%c8, %c0_10] : memref<24x128xf32, #tpu.memory_space<vmem>>, vector<1x128xf32>
    %cst_11 = arith.constant dense<0.000000e+00> : vector<128xf32>
    %18 = vector.multi_reduction <add>, %10, %cst_11 [0] : vector<1x128xf32> to vector<128xf32>
    %19 = vector.shape_cast %18 : vector<128xf32> to vector<1x128xf32>
    %20 = arith.addf %17, %19 : vector<1x128xf32>
    %c8_12 = arith.constant 8 : index
    %c0_13 = arith.constant 0 : index
    %21 = vector.load %arg4[%c8_12, %c0_13] : memref<24x128xf32, #tpu.memory_space<vmem>>, vector<1x128xf32>
    tpu.vector_store %arg4[%c8_12, %c0_13], %20 {strides = array<i32>} : memref<24x128xf32, #tpu.memory_space<vmem>>, vector<1x128xf32>,
    %c16 = arith.constant 16 : index
    %c0_14 = arith.constant 0 : index
    %22 = vector.load %arg4[%c16, %c0_14] : memref<24x128xf32, #tpu.memory_space<vmem>>, vector<1x128xf32>
    %cst_15 = arith.constant dense<0.000000e+00> : vector<128xf32>
    %23 = vector.multi_reduction <add>, %4, %cst_15 [0] : vector<1x128xf32> to vector<128xf32>
    %24 = vector.shape_cast %23 : vector<128xf32> to vector<1x128xf32>
    %25 = arith.addf %22, %24 : vector<1x128xf32>
    %c16_16 = arith.constant 16 : index
    %c0_17 = arith.constant 0 : index
    %26 = vector.load %arg4[%c16_16, %c0_17] : memref<24x128xf32, #tpu.memory_space<vmem>>, vector<1x128xf32>
    tpu.vector_store %arg4[%c16_16, %c0_17], %25 {strides = array<i32>} : memref<24x128xf32, #tpu.memory_space<vmem>>, vector<1x128xf32>,
    return
  }
  func.func @transform_0(%arg0: i32, %arg1: i32) -> (i32, i32) {
    %c1_i32 = arith.constant 1 : i32
    %0 = arith.muli %arg0, %c1_i32 : i32
    %1 = arith.addi %0, %arg1 : i32
    %c0_i32 = arith.constant 0 : i32
    %2 = arith.minsi %1, %c0_i32 : i32
    %c0_i32_0 = arith.constant 0 : i32
    %c0_i32_1 = arith.constant 0 : i32
    return %2, %c0_i32_0 : i32, i32
  }
  func.func @transform_1(%arg0: i32, %arg1: i32) -> (i32, i32) {
    %c1_i32 = arith.constant 1 : i32
    %0 = arith.muli %arg0, %c1_i32 : i32
    %1 = arith.addi %0, %arg1 : i32
    %c0_i32 = arith.constant 0 : i32
    %2 = arith.minsi %1, %c0_i32 : i32
    %c0_i32_0 = arith.constant 0 : i32
    %c0_i32_1 = arith.constant 0 : i32
    return %2, %c0_i32_0 : i32, i32
  }
  func.func @transform_2(%arg0: i32, %arg1: i32) -> (i32, i32) {
    %c0_i32 = arith.constant 0 : i32
    %c0_i32_0 = arith.constant 0 : i32
    return %arg0, %c0_i32 : i32, i32
  }
}

</mosaic_0001>

<bundles_post_ra>
// kernel: tpu_custom_call.1
= control target key start
LH: loop header
LB: loop body
LE: loop exit
PB: predicated region body
PF: predicated region fallthrough
CT: control target
= control target key end

     0   :  { %7 = vsyncpa [#allocation3], 0  ;;  %s209_s0 = inlined_call_operand.hbm [shape: f32[1,128], index: 0, kind: input, shape index: {}]   ;;  %s210_s1 = inlined_call_operand.vmem [shape: f32[1,128], index: 1, kind: input, shape index: {}]   ;;  %s211_s2 = inlined_call_operand.hbm [shape: f32[24,128], index: 2, kind: output, shape index: {}]  }
   0x1   :  { %8 = vsyncpa [#allocation4], 0  ;;  %s162_s9 = smov [#allocation2]   ;;  %s114_s13 = scalar_lea.hbm %s209_s0, 16 }
   0x2   :  { %s20_s10 = sshll.u32 %s162_s9, 4  ;;  %p115_p0 = scmp.ne.s32.totalorder %s209_s0, %s114_s13  ;;  %s21_s10 = int_to_ptr.vmem [resolvable:$true] %s20_s10 }
   0x3   :  { %p118_p1 = scmp.lt.u32.totalorder %s114_s13, %s209_s0 }
   0x5   :  { %p120_p2 = pnand %p118_p1, %p115_p0 }
   0x7   :  { %123 = shalt.err (!%p120_p2)
}
   0x8   :  { %s124_s18 = scalar_lea.vmem %s21_s10, 16  ;;  %s128_s19 = scalar_lea.vmem %s21_s10, 32 }
   0x9   :  { %p125_p3 = scmp.ne.s32.totalorder %s21_s10, %s124_s18  ;;  %p129_p4 = scmp.lt.s32.totalorder %s21_s10, %s21_s10 }
   0xa   :  { %p130_p5 = scmp.lt.s32.totalorder %s128_s19, %s124_s18 }
   0xc   :  { %p131_p6 = por %p130_p5, %p129_p4 }
   0xe   :  { %p132_p7 = pnand %p131_p6, %p125_p3 }
  0x10   :  { %135 = shalt.err (!%p132_p7)
}
  0x11   :  { %23 = dma.hbm_to_vmem [thread:$0]  %s209_s0, 16, %s21_s10, [#allocation3]  }
  0x12   :  { %158 = dma.done.wait [#allocation3], 16  }
  0x13   :  { %159 = vsyncadd [#allocation3], 4294967280  ;;  %v163_v0 = vmov 0.0   ;;  %v63_v1 = vld [vmem:[#allocation2] sm:$0x1]  ;;  %s164_s0 = smov [#allocation5]  }
  0x14   :  { %60 = vst [vmem:[#allocation5] sm:$0xff] %v163_v0  ;;  %61 = vst [vmem:[#allocation5 + $0x8] sm:$0xff] %v163_v0  ;;  %v65_v2 = vsub.f32 0.0, %v63_v1  ;;  %v64_v3 = vld [vmem:[%s210_s1] sm:$0x1]  ;;  %s88_s24 = sshll.u32 %s164_s0, 4  ;;  %s89_s24 = int_to_ptr.vmem [resolvable:$true] %s88_s24 }
  0x15   :  { %62 = vst [vmem:[#allocation5 + $0x10] sm:$0xff] %v163_v0  ;;  %s136_s1 = scalar_lea.vmem %s89_s24, 384  ;;  %p141_p9 = scmp.lt.s32.totalorder %s89_s24, %s89_s24 }
  0x16   :  { %v66_v5 = vmul.f32 1.442695, %v65_v2  ;;  %p137_p8 = scmp.ne.s32.totalorder %s89_s24, %s136_s1  ;;  %p142_p10 = scmp.lt.s32.totalorder %s136_s1, %s136_s1 }
  0x18   :  { %110 = vpow2.f32 %v66_v5  ;;  %p143_p11 = por %p142_p10, %p141_p9 }
  0x1a   :  { %p144_p12 = pnand %p143_p11, %p137_p8 }
  0x1b   :  { %v75_v9 = vld [vmem:[#allocation5 + $0x8] sm:$0x1]  ;;  %v71_v11 = vld [vmem:[#allocation5] sm:$0x1] }
  0x1c   :  { %v79_v4 = vld [vmem:[#allocation5 + $0x10] sm:$0x1] }
  0x1d   :  { %v81_v6 = vadd.f32 %v79_v4, %v64_v3 }
  0x1f   :  { %82 = vst [vmem:[#allocation5 + $0x10] sm:$0x1] %v81_v6 }
  0x22   :  { %v111_v7 = vpop.eup %110 }
  0x23   :  { %v68_v8 = vadd.f32 1.0, %v111_v7 }
  0x25   :  { %112 = vrcp.f32 %v68_v8 }
  0x2f   :  { %v113_v10 = vpop.eup %112 }
  0x30   :  { %v70_v12 = vmul.f32 %v113_v10, %v64_v3  ;;  %v77_v13 = vadd.f32 %v113_v10, %v75_v9 }
  0x32   :  { %v73_v14 = vadd.f32 %v71_v11, %v70_v12  ;;  %78 = vst [vmem:[#allocation5 + $0x8] sm:$0x1] %v77_v13 }
  0x34   :  { %74 = vst [vmem:[#allocation5] sm:$0x1] %v73_v14 }
  0x35   :  { %147 = shalt.err (!%p144_p12)
}
  0x36   :  { %s148_s27 = scalar_lea.hbm %s211_s2, 384 }
  0x37   :  { %p149_p13 = scmp.ne.s32.totalorder %s211_s2, %s148_s27  ;;  %p152_p0 = scmp.lt.u32.totalorder %s148_s27, %s211_s2 }
  0x39   :  { %p154_p1 = pnand %p152_p0, %p149_p13 }
  0x3b   :  { %157 = shalt.err (!%p154_p1)
}
  0x3c   :  { %s165_s4 = smov 128   ;;  %s166_s5 = smov 8  }
  0x3d   :  { %94 = dma.vmem_to_hbm [thread:$0]  %s89_s24, 384, %s211_s2, [#allocation4], %s165_s4, %s165_s4, %s166_s5  }
  0x3e   :  { %160 = dma.done.wait [#allocation4], 384  }
  0x3f   :  { %161 = vsyncadd [#allocation4], 4294966912 }
  0x40   :  { %98 = vsyncpa [#allocation3], 1 }
  0x41   :  { %99 = vsyncpa [#allocation4], 1 }

</bundles_post_ra>
